<compile_context>
chip_gen: v5e
topology: v5e:2x2
jax: 0.10.0
libtpu: 0.0.40
codegen_flags: <defaults>
</compile_context>

<pallas_src>
import jax
import jax.numpy as jnp
from jax.experimental import pallas as pl
from jax.experimental.pallas import tpu as pltpu

IN_FEATURES = 10
OUT_FEATURES = 1


def _linear_kmajor_kernel(xT_ref, w_ref, o_ref):
    # xT: (K, TB) lane-dense block, w: (K, 1) resident weight column, o: (1, TB).
    # VPU broadcast multiply + small sublane sum; no cross-lane XLU reduce and
    # no MXU for a K=10 / OUT=1 contraction.
    o_ref[...] = jnp.sum(
        xT_ref[...] * w_ref[...], axis=0, keepdims=True
    ).astype(o_ref.dtype)


def _cost(batch, k):
    # mul + add per (row, feature); bytes: read x (4K B/row) + write out (4 B/row).
    return pl.CostEstimate(
        flops=2 * k * batch,
        transcendentals=0,
        bytes_accessed=(k + 1) * 4 * batch + k * 4,
    )


def _default_batch_tile():
    # Size the tile so per-step x DMA dwarfs the ~0.35 us per-grid-step overhead,
    # scaled with per-TC HBM bandwidth of the generation.
    try:
        kind = jax.devices()[0].device_kind.lower()
    except Exception:
        kind = ""
    if "v7" in kind or "7x" in kind:
        return 128 * 1024   # ~5.2 MiB of x per step vs ~3.2 TB/s HBM
    if "v6" in kind:
        return 96 * 1024    # ~3.9 MiB per step vs ~1.3 TB/s
    return 64 * 1024        # v5e & fallback: ~2.6 MiB per step, fits default scoped VMEM


def linear_kmajor(xT, wT, *, batch_tile=None):
    """xT: (K, B) f32 (K-major activations), wT: (K, 1) f32. Returns (1, B) f32."""
    K, B = xT.shape
    assert wT.shape == (K, 1)

    if batch_tile is None:
        batch_tile = _default_batch_tile()
    # Lane constraint: a non-full batch tile must be a multiple of 128.
    tb = max(128, ((int(batch_tile) + 127) // 128) * 128)

    cost = _cost(B, K)

    if B <= tb:
        # Single whole-array VMEM block: no grid machinery, no pipeline
        # prologue/epilogue. With the lane-dense layout this covers tens of
        # thousands of rows.
        return pl.pallas_call(
            _linear_kmajor_kernel,
            out_shape=jax.ShapeDtypeStruct((1, B), xT.dtype),
            in_specs=[
                pl.BlockSpec(memory_space=pltpu.MemorySpace.VMEM),
                pl.BlockSpec(memory_space=pltpu.MemorySpace.VMEM),
            ],
            out_specs=pl.BlockSpec(memory_space=pltpu.MemorySpace.VMEM),
            cost_estimate=cost,
        )(xT, wT)

    # Large batch: tile the (lane) batch axis, keep the weight block resident.
    # Ragged last tile is handled by the pipeline (no pad / slice in the wrapper).
    num_tiles = pl.cdiv(B, tb)
    return pl.pallas_call(
        _linear_kmajor_kernel,
        out_shape=jax.ShapeDtypeStruct((1, B), xT.dtype),
        grid=(num_tiles,),
        in_specs=[
            pl.BlockSpec((K, tb), lambda i: (0, i)),
            pl.BlockSpec((K, 1), lambda i: (0, 0)),   # resident across the grid
        ],
        out_specs=pl.BlockSpec((1, tb), lambda i: (0, i)),
        compiler_params=pltpu.CompilerParams(
            dimension_semantics=("parallel",),        # 2-TC sharding on v7x
            vmem_limit_bytes=48 * 1024 * 1024,        # headroom on v7x's 64 MiB VMEM
        ),
        cost_estimate=cost,
    )(xT, wT)


def simple_model_forward(x, weight, *, batch_tile=None):
    """x: (B, 10) f32, weight: (1, 10) f32 (PyTorch nn.Linear layout). Returns (B, 1)."""
    B, K = x.shape
    O, K2 = weight.shape
    assert K == K2 == IN_FEATURES and O == OUT_FEATURES

    # Layout plumbing outside the kernel: present a K-major, lane-dense slab.
    # Callers that already hold K-major activations should call linear_kmajor()
    # directly and skip this transpose pass.
    xT = x.T                        # (K, B)
    wT = weight.reshape(K, O)       # (K, 1); row-major reshape == transpose here

    out = linear_kmajor(xT, wT, batch_tile=batch_tile)   # (1, B), lane-dense
    # (1, B) -> (B, 1): free metadata reshape on a contiguous array.
    return out.reshape(B, O)


if __name__ == "__main__":
    key = jax.random.PRNGKey(0)
    kx, kw, kx2 = jax.random.split(key, 3)

    B, IN, OUT = 8, IN_FEATURES, OUT_FEATURES
    x = jax.random.normal(kx, (B, IN), dtype=jnp.float32)
    # Deterministic init mimicking nn.Linear's kaiming-uniform U(-1/sqrt(K), 1/sqrt(K)).
    bound = 1.0 / jnp.sqrt(jnp.float32(IN))
    weight = jax.random.uniform(
        kw, (OUT, IN), dtype=jnp.float32, minval=-bound, maxval=bound
    )

    # Small-batch (single whole-array block, no grid) path.
    out = simple_model_forward(x, weight)
    jax.block_until_ready(out)
    ref = x @ weight.T
    assert out.shape == (B, OUT)
    assert jnp.allclose(out, ref, atol=1e-5, rtol=1e-5)

    # Exercise the batch-tiled grid path at a still-small size by forcing a small tile.
    B2 = 1024
    x2 = jax.random.normal(kx2, (B2, IN), dtype=jnp.float32)
    out2 = simple_model_forward(x2, weight, batch_tile=256)
    jax.block_until_ready(out2)
    ref2 = x2 @ weight.T
    assert out2.shape == (B2, OUT)
    assert jnp.allclose(out2, ref2, atol=1e-5, rtol=1e-5)

    print("KERNEL_OK")
</pallas_src>

<mosaic_0001>
module attributes {stable_mosaic.version = 11 : i64} {
  func.func @_linear_kmajor_kernel(%arg0: memref<10x8xf32, #tpu.memory_space<vmem>>, %arg1: memref<10x1xf32, #tpu.memory_space<vmem>>, %arg2: memref<1x8xf32, #tpu.memory_space<vmem>>) attributes {dimension_semantics = [], scalar_prefetch = 0 : i64, scratch_operands = 0 : i64, tpu.core_type = #tpu.core_type<tc>} {
    %c0 = arith.constant 0 : index
    %c0_0 = arith.constant 0 : index
    %0 = vector.load %arg0[%c0, %c0_0] : memref<10x8xf32, #tpu.memory_space<vmem>>, vector<10x8xf32>
    %c0_1 = arith.constant 0 : index
    %c0_2 = arith.constant 0 : index
    %1 = vector.load %arg1[%c0_1, %c0_2] : memref<10x1xf32, #tpu.memory_space<vmem>>, vector<10x1xf32>
    %2 = vector.broadcast %1 : vector<10x1xf32> to vector<10x8xf32>
    %3 = arith.mulf %0, %2 : vector<10x8xf32>
    %cst = arith.constant dense<0.000000e+00> : vector<8xf32>
    %4 = vector.multi_reduction <add>, %3, %cst [0] : vector<10x8xf32> to vector<8xf32>
    %5 = vector.shape_cast %4 : vector<8xf32> to vector<1x8xf32>
    %c0_3 = arith.constant 0 : index
    %c0_4 = arith.constant 0 : index
    %6 = vector.load %arg2[%c0_3, %c0_4] : memref<1x8xf32, #tpu.memory_space<vmem>>, vector<1x8xf32>
    tpu.vector_store %arg2[%c0_3, %c0_4], %5 {strides = array<i32>} : memref<1x8xf32, #tpu.memory_space<vmem>>, vector<1x8xf32>,
    return
  }
}

</mosaic_0001>

<bundles_post_ra>
// kernel: tpu_custom_call.1
= control target key start
LH: loop header
LB: loop body
LE: loop exit
PB: predicated region body
PF: predicated region fallthrough
CT: control target
= control target key end

     0   :  { %v86_v1 = vmov 0   ;;  %s118_s0 = inlined_call_operand.vmem [shape: f32[10,8], index: 0, kind: input, shape index: {}]   ;;  %s119_s1 = inlined_call_operand.vmem [shape: f32[10,1], index: 1, kind: input, shape index: {}]   ;;  %s120_s2 = inlined_call_operand.hbm [shape: f32[1,8], index: 2, kind: output, shape index: {}]  }
   0x1   :  { %v14_v0 = vld [vmem:[%s119_s1] sm:$0xff]  ;;  %59 = vset.pattern.permute.xlu0 %v86_v1 }
   0x2   :  { %7 = vsyncpa [#allocation3], 0  ;;  %18 = vperm.xlu0 %59, %v14_v0   ;;  %v15_v2 = vld [vmem:[%s119_s1 + $0x8] sm:$0x3]  ;;  %v12_v4 = vld [vmem:[%s118_s0] sm:$0xff]  ;;  %vm28_vm0 = vcmask 64512  }
   0x3   :  { %v13_v5 = vld [vmem:[%s118_s0 + $0x8] sm:$0x3]  ;;  %vm30_vm1 = vcmask 58368   ;;  %s87_s1 = smov [#allocation2]   ;;  %s48_s20 = sshll.u32 %s120_s2, 4  ;;  %vm39_vm2 = vcmask 57344   ;;  %s49_s20 = int_to_ptr.hbm [resolvable:$true] %s48_s20 }
   0x4   :  { %s46_s17 = sshll.u32 %s87_s1, 4  ;;  %s47_s17 = int_to_ptr.vmem [resolvable:$true] %s46_s17 }
   0xa   :  { %23 = vperm.xlu0 %59, %v15_v2  }
  0x74   :  { %v19_v3 = vpop.permute.xlu0 %18 }
  0x75   :  { %v26_v6 = vmul.f32 %v19_v3, %v12_v4 }
  0x77   :  { %v29_v9 = vsel %vm28_vm0, %v26_v6, 0.0 }
  0x7c   :  { %v24_v7 = vpop.permute.xlu0 %23 }
  0x7d   :  { %v27_v8 = vmul.f32 %v24_v7, %v13_v5 }
  0x7f   :  { %v31_v10 = vsel %vm30_vm1, %v27_v8, 0.0 }
  0x80   :  { %v32_v11 = vadd.f32 %v31_v10, %v29_v9 }
  0x82   :  { %v33_v12 = vrot.slane %v32_v11, 4 }
  0x84   :  { %v34_v13 = vadd.f32 %v33_v12, %v32_v11 }
  0x86   :  { %v35_v14 = vrot.slane %v34_v13, 2 }
  0x88   :  { %v36_v15 = vadd.f32 %v35_v14, %v34_v13 }
  0x8a   :  { %v37_v16 = vrot.slane %v36_v15, 1 }
  0x8c   :  { %v38_v17 = vadd.f32 %v37_v16, %v36_v15 }
  0x8e   :  { %40 = vst.msk [vmem:[#allocation2] sm:$0x1] %vm39_vm2, %v38_v17 }
  0x8f   :  { %51 = dma.vmem_to_hbm [thread:$0]  %s47_s17, 16, %s49_s20, [#allocation3]  }
  0x90   :  { %84 = dma.done.wait [#allocation3], 16  }
  0x91   :  { %85 = vsyncadd [#allocation3], 4294967280 }
  0x92   :  { %56 = vsyncpa [#allocation3], 1 }

</bundles_post_ra>
